<compile_context>
chip_gen: v7x
topology: tpu7x:2x2x1
jax: 0.10.0
libtpu: 0.0.40
codegen_flags: <defaults>
</compile_context>

<pallas_src>
import functools
import numpy as np
import jax
import jax.numpy as jnp
from jax.experimental import pallas as pl
from jax.experimental.pallas import tpu as pltpu


# ----------------------------------------------------------------------------
# Pallas kernel
# ----------------------------------------------------------------------------
def _generator_kernel(num_layers, T, H, C, hoist_whh, *refs):
    """Stacked LSTM (batch=1): fused embedding, hoisted+chunked input proj."""
    n_extra = 3 * (num_layers - 1)
    idx_ref = refs[0]                          # (T,)   int32, SMEM token ids
    table0_ref = refs[1]                       # (Vp1, 4H) f32: emb @ W_ih0^T + b0
    whh0_ref = refs[2]                         # (H, 4H)   layer-0 recurrent weights
    upper_refs = refs[3:3 + n_extra]           # per layer >=1: (w_ihT, w_hhT, bias)
    out_ref, hn_ref, cn_ref = refs[3 + n_extra:3 + n_extra + 3]
    scratches = refs[3 + n_extra + 3:]
    inter = scratches[:num_layers - 1]         # (Tp, H)  f32 per non-final layer
    gx_scr = scratches[num_layers - 1] if num_layers > 1 else None  # (C, 4H) f32

    Tp = ((T + 7) // 8) * 8
    n_full, rem = divmod(T, 8)

    # Loop-invariant sublane-id tile (hoisted: JAX does not CSE broadcast_in_dim).
    rows8 = jax.lax.broadcasted_iota(jnp.int32, (8, H), 0)

    def whh_getter(ref):
        # Hoist the recurrent weight out of the recurrence when small enough
        # to live in vregs; otherwise read it from VMEM inside the step.
        if hoist_whh:
            w = ref[...]
            return lambda: w
        return lambda: ref[...]

    def make_step(gx_fn, whh_fn, out_tgt, t_base):
        def step(i, carry):
            h, c, htile = carry
            t = t_base + i
            w_hh = whh_fn()
            # gates_x is precomputed (table lookup for layer 0, chunked scratch
            # for layers >= 1); only the 1-row recurrent matmul stays on the
            # serial critical path.  MXU operands may be bf16; accumulate f32.
            gates = gx_fn(i) + jnp.dot(h.astype(w_hh.dtype), w_hh,
                                       preferred_element_type=jnp.float32)  # (1,4H)
            # Gate layout is [i | f | o | g]: one sigmoid over 3H lanes, one
            # tanh over H lanes (halves EUP work vs full-vector sigmoid+tanh).
            sig = jax.nn.sigmoid(gates[:, :3 * H])
            g_g = jnp.tanh(gates[:, 3 * H:])
            i_g = sig[:, 0:H]
            f_g = sig[:, H:2 * H]
            o_g = sig[:, 2 * H:3 * H]
            c_new = f_g * c + i_g * g_g
            h_new = o_g * jnp.tanh(c_new)

            # Accumulate h into an (8, H) tile; flush once per 8 steps with a
            # sublane-aligned 8-row store instead of T masked 1-row stores.
            row = t % 8
            htile = jnp.where(rows8 == row, h_new, htile)

            @pl.when(row == 7)
            def _():
                base = pl.multiple_of(t - 7, 8)
                out_tgt[pl.ds(base, 8), :] = htile.astype(out_tgt.dtype)

            return (h_new, c_new, htile)
        return step

    def init_carry():
        return (jnp.zeros((1, H), jnp.float32),
                jnp.zeros((1, H), jnp.float32),
                jnp.zeros((8, H), jnp.float32))

    def finalize_layer(layer, carry, out_tgt):
        h_f, c_f, htile_f = carry
        if rem != 0:
            # Flush the trailing partial tile into padded output rows
            # (rows >= T are sliced off by the wrapper / never consumed).
            out_tgt[pl.ds(n_full * 8, 8), :] = htile_f.astype(out_tgt.dtype)
        hn_ref[pl.ds(layer, 1), :] = h_f
        cn_ref[pl.ds(layer, 1), :] = c_f

    # ---- layer 0: embedding fused with the input projection (table lookup) --
    tgt0 = out_ref if num_layers == 1 else inter[0]
    whh0_fn = whh_getter(whh0_ref)
    step0 = make_step(lambda i: table0_ref[pl.ds(idx_ref[i], 1), :],
                      whh0_fn, tgt0, 0)
    carry = jax.lax.fori_loop(0, T, step0, init_carry())
    finalize_layer(0, carry, tgt0)

    # ---- layers 1..L-1: chunked hoisted input projection + recurrence -------
    for l in range(1, num_layers):
        w_ihT_ref, w_hhT_ref, bias_ref = upper_refs[3 * (l - 1):3 * l]
        src = inter[l - 1]
        tgt = out_ref if l == num_layers - 1 else inter[l]
        whh_fn = whh_getter(w_hhT_ref)

        carry = init_carry()
        n_chunks = (T + C - 1) // C            # static Python loop over chunks
        for k in range(n_chunks):
            t0 = k * C
            n_rows = min(C, Tp - t0)           # rows to project (multiple of 8)
            n_steps = min(C, T - t0)           # steps actually consumed
            gx_scr[0:n_rows, :] = (
                jnp.dot(src[t0:t0 + n_rows, :].astype(w_ihT_ref.dtype),
                        w_ihT_ref[...],
                        preferred_element_type=jnp.float32)
                + bias_ref[...])               # (n_rows, 4H) f32
            stepk = make_step(lambda i: gx_scr[pl.ds(i, 1), :],
                              whh_fn, tgt, t0)
            carry = jax.lax.fori_loop(0, n_steps, stepk, carry)
        finalize_layer(l, carry, tgt)


# ----------------------------------------------------------------------------
# Wrapper
# ----------------------------------------------------------------------------
def generator_forward(tokens, emb_table, layer_params, *, hidden_size,
                      mxu_dtype=jnp.bfloat16, chunk_rows=512):
    """Returns (output (T,1,H), (h_n (L,1,H), c_n (L,1,H))) like the PyTorch module."""
    T = tokens.shape[0]
    H = hidden_size
    L = len(layer_params)
    Tp = ((T + 7) // 8) * 8
    C = min(Tp, ((chunk_rows + 7) // 8) * 8)   # chunk of the hoisted projection
    hp = jax.lax.Precision.HIGHEST

    idx = tokens.astype(jnp.int32)

    def reorder(x):
        # torch gate order [i|f|g|o] -> kernel order [i|f|o|g] along last axis,
        # so sigmoid covers a single contiguous 3H block and tanh the last H.
        return jnp.concatenate([x[..., :2 * H], x[..., 3 * H:], x[..., 2 * H:3 * H]],
                               axis=-1)

    # Fuse nn.Embedding with layer 0's input-to-hidden projection (weights-only
    # precompute): row v of table0 is W_ih0 @ emb[v] + b_ih0 + b_hh0.
    # padding_idx=0 is honored because emb row 0 is zero -> table0[0] = bias0.
    w_ih0, w_hh0, b_ih0, b_hh0 = layer_params[0]
    table0 = reorder(jnp.dot(emb_table, w_ih0.T, precision=hp)
                     + (b_ih0 + b_hh0)[None, :])              # (Vp1, 4H) f32

    flat = [idx, table0, reorder(w_hh0.T).astype(mxu_dtype)]
    for (w_ih, w_hh, b_ih, b_hh) in layer_params[1:]:
        flat += [reorder(w_ih.T).astype(mxu_dtype),
                 reorder(w_hh.T).astype(mxu_dtype),
                 reorder(b_ih + b_hh).reshape(1, 4 * H)]      # bias stays f32

    # Hoist W_hh out of the loop only when it fits comfortably in vregs.
    hoist_whh = (H * 4 * H * np.dtype(mxu_dtype).itemsize) <= (64 << 10)

    kernel = functools.partial(_generator_kernel, L, T, H, C, hoist_whh)

    smem = pl.BlockSpec(memory_space=pltpu.MemorySpace.SMEM)
    vmem = pl.BlockSpec(memory_space=pltpu.MemorySpace.VMEM)
    in_specs = [smem] + [vmem] * (2 + 3 * (L - 1))
    out_specs = (vmem, vmem, vmem)
    scratch_shapes = [pltpu.VMEM((Tp, H), jnp.float32) for _ in range(L - 1)]
    if L > 1:
        scratch_shapes.append(pltpu.VMEM((C, 4 * H), jnp.float32))

    # Size the scoped VMEM limit from the actual buffer sum (+50% headroom),
    # capped at 64 MiB so it stays within physical VMEM on every generation.
    in_bytes = sum(int(a.size) * a.dtype.itemsize for a in flat[1:])
    out_bytes = (Tp * H + 2 * L * H) * 4
    scr_bytes = ((L - 1) * Tp * H + (C * 4 * H if L > 1 else 0)) * 4
    vmem_limit = int(1.5 * (in_bytes + out_bytes + scr_bytes)) + (2 << 20)
    vmem_limit = max(16 << 20, min(vmem_limit, 64 << 20))

    out, h_n, c_n = pl.pallas_call(
        kernel,
        out_shape=(jax.ShapeDtypeStruct((Tp, H), jnp.float32),
                   jax.ShapeDtypeStruct((L, H), jnp.float32),
                   jax.ShapeDtypeStruct((L, H), jnp.float32)),
        in_specs=in_specs,
        out_specs=out_specs,
        scratch_shapes=scratch_shapes,
        compiler_params=pltpu.CompilerParams(vmem_limit_bytes=vmem_limit),
    )(*flat)

    return (out[:T].reshape(T, 1, H),
            (h_n.reshape(L, 1, H), c_n.reshape(L, 1, H)))


# ----------------------------------------------------------------------------
# Pure-JAX reference (mirrors torch.nn.Embedding + torch.nn.LSTM semantics)
# ----------------------------------------------------------------------------
def reference_forward(tokens, emb_table, layer_params, hidden_size):
    H = hidden_size
    hp = jax.lax.Precision.HIGHEST
    x = emb_table[tokens]                                # (T, E)
    hs, cs = [], []
    for (w_ih, w_hh, b_ih, b_hh) in layer_params:
        h = jnp.zeros((H,), jnp.float32)
        c = jnp.zeros((H,), jnp.float32)
        outs = []
        for t in range(x.shape[0]):
            gates = (jnp.dot(w_ih, x[t], precision=hp) + b_ih
                     + jnp.dot(w_hh, h, precision=hp) + b_hh)
            i = jax.nn.sigmoid(gates[0 * H:1 * H])
            f = jax.nn.sigmoid(gates[1 * H:2 * H])
            g = jnp.tanh(gates[2 * H:3 * H])
            o = jax.nn.sigmoid(gates[3 * H:4 * H])
            c = f * c + i * g
            h = o * jnp.tanh(c)
            outs.append(h)
        x = jnp.stack(outs)
        hs.append(h)
        cs.append(c)
    return (x.reshape(-1, 1, H),
            jnp.stack(hs).reshape(-1, 1, H),
            jnp.stack(cs).reshape(-1, 1, H))


# ----------------------------------------------------------------------------
if __name__ == "__main__":
    # Small shapes consistent with the module.  T=10 exercises both the full
    # 8-row flush and the trailing partial-tile flush.
    T = 10                # sequence length (input.shape[0])
    input_size = 16       # embedding dim / LSTM input size
    hidden_size = 32
    num_layers = 2
    voc_size = 31
    Vp1 = voc_size + 1

    key = jax.random.PRNGKey(0)
    keys = jax.random.split(key, 2 + 4 * num_layers)

    # Embedding table; padding_idx=0 row is zero (as PyTorch initializes it).
    emb_table = jax.random.normal(keys[0], (Vp1, input_size), jnp.float32)
    emb_table = emb_table.at[0].set(0.0)

    # Token sequence (includes the padding index occasionally).
    tokens = jax.random.randint(keys[1], (T,), 0, Vp1, dtype=jnp.int32)

    # LSTM parameters, PyTorch-style uniform(-1/sqrt(H), 1/sqrt(H)).
    bound = 1.0 / float(np.sqrt(hidden_size))
    layer_params = []
    for layer in range(num_layers):
        in_dim = input_size if layer == 0 else hidden_size
        kk = keys[2 + 4 * layer: 2 + 4 * layer + 4]
        w_ih = jax.random.uniform(kk[0], (4 * hidden_size, in_dim),
                                  jnp.float32, -bound, bound)
        w_hh = jax.random.uniform(kk[1], (4 * hidden_size, hidden_size),
                                  jnp.float32, -bound, bound)
        b_ih = jax.random.uniform(kk[2], (4 * hidden_size,),
                                  jnp.float32, -bound, bound)
        b_hh = jax.random.uniform(kk[3], (4 * hidden_size,),
                                  jnp.float32, -bound, bound)
        layer_params.append((w_ih, w_hh, b_ih, b_hh))

    ref_out, ref_h, ref_c = reference_forward(tokens, emb_table, layer_params,
                                              hidden_size)

    def _check(a, b, name, tol):
        err = float(jnp.max(jnp.abs(a - b)))
        if err > tol:
            raise AssertionError(f"{name} mismatch, max abs err={err}")

    # 1) exact-dtype path (f32 everywhere): strict tolerance.
    out, (h_n, c_n) = generator_forward(tokens, emb_table, layer_params,
                                        hidden_size=hidden_size,
                                        mxu_dtype=jnp.float32)
    jax.block_until_ready((out, h_n, c_n))
    _check(out, ref_out, "output(f32)", 2e-3)
    _check(h_n, ref_h, "h_n(f32)", 2e-3)
    _check(c_n, ref_c, "c_n(f32)", 2e-3)

    # 2) production path (bf16 MXU operands, f32 accumulation + elementwise):
    #    looser tolerance for the bf16 weight rounding accumulated over T steps.
    out16, (h16, c16) = generator_forward(tokens, emb_table, layer_params,
                                          hidden_size=hidden_size)
    jax.block_until_ready((out16, h16, c16))
    _check(out16, ref_out, "output(bf16)", 3e-2)
    _check(h16, ref_h, "h_n(bf16)", 3e-2)
    _check(c16, ref_c, "c_n(bf16)", 3e-2)

    print("KERNEL_OK")
</pallas_src>

<mosaic_0001>
module attributes {stable_mosaic.version = 11 : i64} {
  func.func @_generator_kernel(%arg0: memref<10xi32, #tpu.memory_space<smem>>, %arg1: memref<32x128xf32, #tpu.memory_space<vmem>>, %arg2: memref<32x128xf32, #tpu.memory_space<vmem>>, %arg3: memref<32x128xf32, #tpu.memory_space<vmem>>, %arg4: memref<32x128xf32, #tpu.memory_space<vmem>>, %arg5: memref<1x128xf32, #tpu.memory_space<vmem>>, %arg6: memref<16x32xf32, #tpu.memory_space<vmem>>, %arg7: memref<2x32xf32, #tpu.memory_space<vmem>>, %arg8: memref<2x32xf32, #tpu.memory_space<vmem>>, %arg9: memref<16x32xf32, #tpu.memory_space<vmem>>, %arg10: memref<16x128xf32, #tpu.memory_space<vmem>>) attributes {dimension_semantics = [], scalar_prefetch = 0 : i64, scratch_operands = 2 : i64, tpu.core_type = #tpu.core_type<tc>} {
    %0 = tpu.iota {dimensions = array<i32: 0>} : vector<8x32xi32>
    %c0 = arith.constant 0 : index
    %c0_0 = arith.constant 0 : index
    %1 = vector.load %arg2[%c0, %c0_0] : memref<32x128xf32, #tpu.memory_space<vmem>>, vector<32x128xf32>
    %cst = arith.constant 0.000000e+00 : f32
    %2 = vector.broadcast %cst : f32 to vector<1x32xf32>
    %cst_1 = arith.constant 0.000000e+00 : f32
    %3 = vector.broadcast %cst_1 : f32 to vector<1x32xf32>
    %cst_2 = arith.constant 0.000000e+00 : f32
    %4 = vector.broadcast %cst_2 : f32 to vector<8x32xf32>
    %c0_i32 = arith.constant 0 : i32
    %c10_i32 = arith.constant 10 : i32
    %5 = arith.addi %c0_i32, %c10_i32 : i32
    %c1_i32 = arith.constant 1 : i32
    %6:3 = scf.for %arg11 = %c0_i32 to %5 step %c1_i32 iter_args(%arg12 = %2, %arg13 = %3, %arg14 = %4) -> (vector<1x32xf32>, vector<1x32xf32>, vector<8x32xf32>)  : i32 {
      %c0_i32_32 = arith.constant 0 : i32
      %26 = arith.addi %c0_i32_32, %arg11 : i32
      %27 = arith.index_cast %arg11 : i32 to index
      %28 = memref.load %arg0[%27] : memref<10xi32, #tpu.memory_space<smem>>
      %29 = arith.index_cast %28 : i32 to index
      %c0_33 = arith.constant 0 : index
      %30 = vector.load %arg1[%29, %c0_33] : memref<32x128xf32, #tpu.memory_space<vmem>>, vector<1x128xf32>
      %cst_34 = arith.constant dense<0.000000e+00> : vector<1x128xf32>
      %31 = tpu.matmul %arg12, %1, %cst_34 {dimension_numbers = #tpu.dot_dimension_numbers<[1], [0], [0], [1], [0, 0, 1, 1], [], []>} : vector<1x32xf32>, vector<32x128xf32>, vector<1x128xf32> -> vector<1x128xf32>
      %32 = arith.addf %30, %31 : vector<1x128xf32>
      %33 = vector.extract_strided_slice %32 {offsets = [0, 0], sizes = [1, 96], strides = [1, 1]} : vector<1x128xf32> to vector<1x96xf32>
      %34 = arith.negf %33 : vector<1x96xf32>
      %35 = math.exp %34 : vector<1x96xf32>
      %cst_35 = arith.constant 1.000000e+00 : f32
      %36 = vector.broadcast %cst_35 : f32 to vector<1x96xf32>
      %37 = arith.addf %36, %35 : vector<1x96xf32>
      %38 = arith.divf %36, %37 : vector<1x96xf32>
      %39 = vector.extract_strided_slice %32 {offsets = [0, 96], sizes = [1, 32], strides = [1, 1]} : vector<1x128xf32> to vector<1x32xf32>
      %40 = math.tanh %39 : vector<1x32xf32>
      %41 = vector.extract_strided_slice %38 {offsets = [0, 0], sizes = [1, 32], strides = [1, 1]} : vector<1x96xf32> to vector<1x32xf32>
      %42 = vector.extract_strided_slice %38 {offsets = [0, 32], sizes = [1, 32], strides = [1, 1]} : vector<1x96xf32> to vector<1x32xf32>
      %43 = vector.extract_strided_slice %38 {offsets = [0, 64], sizes = [1, 32], strides = [1, 1]} : vector<1x96xf32> to vector<1x32xf32>
      %44 = arith.mulf %42, %arg13 : vector<1x32xf32>
      %45 = arith.mulf %41, %40 : vector<1x32xf32>
      %46 = arith.addf %44, %45 : vector<1x32xf32>
      %47 = math.tanh %46 : vector<1x32xf32>
      %48 = arith.mulf %43, %47 : vector<1x32xf32>
      %c8_i32 = arith.constant 8 : i32
      %c0_i32_36 = arith.constant 0 : i32
      %49 = arith.cmpi eq, %c8_i32, %c0_i32_36 : i32
      %c1_i32_37 = arith.constant 1 : i32
      %50 = arith.select %49, %c1_i32_37, %c8_i32 : i32
      %51 = arith.remsi %26, %50 : i32
      %c0_i32_38 = arith.constant 0 : i32
      %52 = arith.cmpi ne, %51, %c0_i32_38 : i32
      %c0_i32_39 = arith.constant 0 : i32
      %53 = arith.cmpi slt, %51, %c0_i32_39 : i32
      %c0_i32_40 = arith.constant 0 : i32
      %54 = arith.cmpi slt, %50, %c0_i32_40 : i32
      %55 = arith.xori %53, %54 : i1
      %56 = arith.andi %55, %52 : i1
      %57 = arith.addi %51, %50 : i32
      %58 = arith.select %56, %57, %51 : i32
      %59 = vector.broadcast %58 : i32 to vector<8x32xi32>
      %60 = arith.cmpi eq, %0, %59 : vector<8x32xi32>
      %61 = vector.shape_cast %48 : vector<1x32xf32> to vector<1x32xf32>
      %62 = vector.broadcast %61 : vector<1x32xf32> to vector<8x32xf32>
      %63 = arith.select %60, %62, %arg14 : vector<8x32xi1>, vector<8x32xf32>
      %c7_i32 = arith.constant 7 : i32
      %64 = arith.cmpi eq, %58, %c7_i32 : i32
      %65 = arith.extui %64 : i1 to i32
      %c0_i32_41 = arith.constant 0 : i32
      %66 = arith.cmpi ne, %65, %c0_i32_41 : i32
      scf.if %66 {
        %c7_i32_42 = arith.constant 7 : i32
        %67 = arith.subi %26, %c7_i32_42 : i32
        %68 = tpu.assume_multiple %67, 8 : i32
        %69 = arith.index_cast %68 : i32 to index
        %c0_43 = arith.constant 0 : index
        %70 = vector.load %arg9[%69, %c0_43] : memref<16x32xf32, #tpu.memory_space<vmem>>, vector<8x32xf32>
        tpu.vector_store %arg9[%69, %c0_43], %63 {strides = array<i32>} : memref<16x32xf32, #tpu.memory_space<vmem>>, vector<8x32xf32>,
      } else {
      }
      scf.yield %48, %46, %63 : vector<1x32xf32>, vector<1x32xf32>, vector<8x32xf32>
    }
    %c10_i32_3 = arith.constant 10 : i32
    %c8 = arith.constant 8 : index
    %c0_4 = arith.constant 0 : index
    %7 = vector.load %arg9[%c8, %c0_4] : memref<16x32xf32, #tpu.memory_space<vmem>>, vector<8x32xf32>
    tpu.vector_store %arg9[%c8, %c0_4], %6#2 {strides = array<i32>} : memref<16x32xf32, #tpu.memory_space<vmem>>, vector<8x32xf32>,
    %c0_5 = arith.constant 0 : index
    %c0_6 = arith.constant 0 : index
    %8 = vector.load %arg7[%c0_5, %c0_6] : memref<2x32xf32, #tpu.memory_space<vmem>>, vector<1x32xf32>
    tpu.vector_store %arg7[%c0_5, %c0_6], %6#0 {strides = array<i32>} : memref<2x32xf32, #tpu.memory_space<vmem>>, vector<1x32xf32>,
    %c0_7 = arith.constant 0 : index
    %c0_8 = arith.constant 0 : index
    %9 = vector.load %arg8[%c0_7, %c0_8] : memref<2x32xf32, #tpu.memory_space<vmem>>, vector<1x32xf32>
    tpu.vector_store %arg8[%c0_7, %c0_8], %6#1 {strides = array<i32>} : memref<2x32xf32, #tpu.memory_space<vmem>>, vector<1x32xf32>,
    %c0_9 = arith.constant 0 : index
    %c0_10 = arith.constant 0 : index
    %10 = vector.load %arg4[%c0_9, %c0_10] : memref<32x128xf32, #tpu.memory_space<vmem>>, vector<32x128xf32>
    %cst_11 = arith.constant 0.000000e+00 : f32
    %11 = vector.broadcast %cst_11 : f32 to vector<1x32xf32>
    %cst_12 = arith.constant 0.000000e+00 : f32
    %12 = vector.broadcast %cst_12 : f32 to vector<1x32xf32>
    %cst_13 = arith.constant 0.000000e+00 : f32
    %13 = vector.broadcast %cst_13 : f32 to vector<8x32xf32>
    %c0_14 = arith.constant 0 : index
    %c0_15 = arith.constant 0 : index
    %14 = vector.load %arg9[%c0_14, %c0_15] : memref<16x32xf32, #tpu.memory_space<vmem>>, vector<16x32xf32>
    %c0_16 = arith.constant 0 : index
    %c0_17 = arith.constant 0 : index
    %15 = vector.load %arg3[%c0_16, %c0_17] : memref<32x128xf32, #tpu.memory_space<vmem>>, vector<32x128xf32>
    %cst_18 = arith.constant dense<0.000000e+00> : vector<16x128xf32>
    %16 = tpu.matmul %14, %15, %cst_18 {dimension_numbers = #tpu.dot_dimension_numbers<[1], [0], [0], [1], [0, 0, 1, 1], [], []>} : vector<16x32xf32>, vector<32x128xf32>, vector<16x128xf32> -> vector<16x128xf32>
    %c0_19 = arith.constant 0 : index
    %c0_20 = arith.constant 0 : index
    %17 = vector.load %arg5[%c0_19, %c0_20] : memref<1x128xf32, #tpu.memory_space<vmem>>, vector<1x128xf32>
    %18 = vector.broadcast %17 : vector<1x128xf32> to vector<16x128xf32>
    %19 = arith.addf %16, %18 : vector<16x128xf32>
    %c0_21 = arith.constant 0 : index
    %c0_22 = arith.constant 0 : index
    %20 = vector.load %arg10[%c0_21, %c0_22] : memref<16x128xf32, #tpu.memory_space<vmem>>, vector<16x128xf32>
    tpu.vector_store %arg10[%c0_21, %c0_22], %19 {strides = array<i32>} : memref<16x128xf32, #tpu.memory_space<vmem>>, vector<16x128xf32>,
    %c0_i32_23 = arith.constant 0 : i32
    %c10_i32_24 = arith.constant 10 : i32
    %21 = arith.addi %c0_i32_23, %c10_i32_24 : i32
    %c1_i32_25 = arith.constant 1 : i32
    %22:3 = scf.for %arg11 = %c0_i32_23 to %21 step %c1_i32_25 iter_args(%arg12 = %11, %arg13 = %12, %arg14 = %13) -> (vector<1x32xf32>, vector<1x32xf32>, vector<8x32xf32>)  : i32 {
      %c0_i32_32 = arith.constant 0 : i32
      %26 = arith.addi %c0_i32_32, %arg11 : i32
      %27 = arith.index_cast %arg11 : i32 to index
      %c0_33 = arith.constant 0 : index
      %28 = vector.load %arg10[%27, %c0_33] : memref<16x128xf32, #tpu.memory_space<vmem>>, vector<1x128xf32>
      %cst_34 = arith.constant dense<0.000000e+00> : vector<1x128xf32>
      %29 = tpu.matmul %arg12, %10, %cst_34 {dimension_numbers = #tpu.dot_dimension_numbers<[1], [0], [0], [1], [0, 0, 1, 1], [], []>} : vector<1x32xf32>, vector<32x128xf32>, vector<1x128xf32> -> vector<1x128xf32>
      %30 = arith.addf %28, %29 : vector<1x128xf32>
      %31 = vector.extract_strided_slice %30 {offsets = [0, 0], sizes = [1, 96], strides = [1, 1]} : vector<1x128xf32> to vector<1x96xf32>
      %32 = arith.negf %31 : vector<1x96xf32>
      %33 = math.exp %32 : vector<1x96xf32>
      %cst_35 = arith.constant 1.000000e+00 : f32
      %34 = vector.broadcast %cst_35 : f32 to vector<1x96xf32>
      %35 = arith.addf %34, %33 : vector<1x96xf32>
      %36 = arith.divf %34, %35 : vector<1x96xf32>
      %37 = vector.extract_strided_slice %30 {offsets = [0, 96], sizes = [1, 32], strides = [1, 1]} : vector<1x128xf32> to vector<1x32xf32>
      %38 = math.tanh %37 : vector<1x32xf32>
      %39 = vector.extract_strided_slice %36 {offsets = [0, 0], sizes = [1, 32], strides = [1, 1]} : vector<1x96xf32> to vector<1x32xf32>
      %40 = vector.extract_strided_slice %36 {offsets = [0, 32], sizes = [1, 32], strides = [1, 1]} : vector<1x96xf32> to vector<1x32xf32>
      %41 = vector.extract_strided_slice %36 {offsets = [0, 64], sizes = [1, 32], strides = [1, 1]} : vector<1x96xf32> to vector<1x32xf32>
      %42 = arith.mulf %40, %arg13 : vector<1x32xf32>
      %43 = arith.mulf %39, %38 : vector<1x32xf32>
      %44 = arith.addf %42, %43 : vector<1x32xf32>
      %45 = math.tanh %44 : vector<1x32xf32>
      %46 = arith.mulf %41, %45 : vector<1x32xf32>
      %c8_i32 = arith.constant 8 : i32
      %c0_i32_36 = arith.constant 0 : i32
      %47 = arith.cmpi eq, %c8_i32, %c0_i32_36 : i32
      %c1_i32_37 = arith.constant 1 : i32
      %48 = arith.select %47, %c1_i32_37, %c8_i32 : i32
      %49 = arith.remsi %26, %48 : i32
      %c0_i32_38 = arith.constant 0 : i32
      %50 = arith.cmpi ne, %49, %c0_i32_38 : i32
      %c0_i32_39 = arith.constant 0 : i32
      %51 = arith.cmpi slt, %49, %c0_i32_39 : i32
      %c0_i32_40 = arith.constant 0 : i32
      %52 = arith.cmpi slt, %48, %c0_i32_40 : i32
      %53 = arith.xori %51, %52 : i1
      %54 = arith.andi %53, %50 : i1
      %55 = arith.addi %49, %48 : i32
      %56 = arith.select %54, %55, %49 : i32
      %57 = vector.broadcast %56 : i32 to vector<8x32xi32>
      %58 = arith.cmpi eq, %0, %57 : vector<8x32xi32>
      %59 = vector.shape_cast %46 : vector<1x32xf32> to vector<1x32xf32>
      %60 = vector.broadcast %59 : vector<1x32xf32> to vector<8x32xf32>
      %61 = arith.select %58, %60, %arg14 : vector<8x32xi1>, vector<8x32xf32>
      %c7_i32 = arith.constant 7 : i32
      %62 = arith.cmpi eq, %56, %c7_i32 : i32
      %63 = arith.extui %62 : i1 to i32
      %c0_i32_41 = arith.constant 0 : i32
      %64 = arith.cmpi ne, %63, %c0_i32_41 : i32
      scf.if %64 {
        %c7_i32_42 = arith.constant 7 : i32
        %65 = arith.subi %26, %c7_i32_42 : i32
        %66 = tpu.assume_multiple %65, 8 : i32
        %67 = arith.index_cast %66 : i32 to index
        %c0_43 = arith.constant 0 : index
        %68 = vector.load %arg6[%67, %c0_43] : memref<16x32xf32, #tpu.memory_space<vmem>>, vector<8x32xf32>
        tpu.vector_store %arg6[%67, %c0_43], %61 {strides = array<i32>} : memref<16x32xf32, #tpu.memory_space<vmem>>, vector<8x32xf32>,
      } else {
      }
      scf.yield %46, %44, %61 : vector<1x32xf32>, vector<1x32xf32>, vector<8x32xf32>
    }
    %c10_i32_26 = arith.constant 10 : i32
    %c8_27 = arith.constant 8 : index
    %c0_28 = arith.constant 0 : index
    %23 = vector.load %arg6[%c8_27, %c0_28] : memref<16x32xf32, #tpu.memory_space<vmem>>, vector<8x32xf32>
    tpu.vector_store %arg6[%c8_27, %c0_28], %22#2 {strides = array<i32>} : memref<16x32xf32, #tpu.memory_space<vmem>>, vector<8x32xf32>,
    %c1 = arith.constant 1 : index
    %c0_29 = arith.constant 0 : index
    %24 = vector.load %arg7[%c1, %c0_29] : memref<2x32xf32, #tpu.memory_space<vmem>>, vector<1x32xf32>
    tpu.vector_store %arg7[%c1, %c0_29], %22#0 {strides = array<i32>} : memref<2x32xf32, #tpu.memory_space<vmem>>, vector<1x32xf32>,
    %c1_30 = arith.constant 1 : index
    %c0_31 = arith.constant 0 : index
    %25 = vector.load %arg8[%c1_30, %c0_31] : memref<2x32xf32, #tpu.memory_space<vmem>>, vector<1x32xf32>
    tpu.vector_store %arg8[%c1_30, %c0_31], %22#1 {strides = array<i32>} : memref<2x32xf32, #tpu.memory_space<vmem>>, vector<1x32xf32>,
    return
  }
}

</mosaic_0001>

<bundles_post_ra>
// kernel: tpu_custom_call.1
= control target key start
LH: loop header
LB: loop body
LE: loop exit
PB: predicated region body
PF: predicated region fallthrough
CT: control target
= control target key end

     0   :  { %14 = vsyncpa [#allocation7], 0  ;;  %s1337_s0 = inlined_call_operand.hbm [shape: s32[10], index: 0, kind: input, shape index: {}]   ;;  %s1338_s1 = inlined_call_operand.hbm [shape: f32[32,128], index: 1, kind: input, shape index: {}]   ;;  %s1339_s2 = inlined_call_operand.hbm [shape: f32[32,128], index: 2, kind: input, shape index: {}]   ;;  %s1340_s3 = inlined_call_operand.hbm [shape: f32[32,128], index: 3, kind: input, shape index: {}]   ;;  %s1341_s4 = inlined_call_operand.hbm [shape: f32[32,128], index: 4, kind: input, shape index: {}]   ;;  %s1342_s5 = inlined_call_operand.vmem [shape: f32[1,128], index: 5, kind: input, shape index: {}]   ;;  %s1343_s6 = inlined_call_operand.hbm [shape: f32[16,32], index: 6, kind: output, shape index: {0}]   ;;  %s1344_s7 = inlined_call_operand.hbm [shape: f32[2,32], index: 7, kind: output, shape index: {1}]   ;;  %s1345_s8 = inlined_call_operand.hbm [shape: f32[2,32], index: 8, kind: output, shape index: {2}]  }
   0x1   :  { %15 = vsyncpa [#allocation5], 0 }
   0x2   :  { %16 = vsyncpa [#allocation10], 0 }
   0x3   :  { %17 = vsyncpa [#allocation13], 0 }
   0x4   :  { %18 = vsyncpa [#allocation6], 0 }
   0x5   :  { %19 = vsyncpa [#allocation16], 0  ;;  %s1033_s27 = smov [#allocation9]   ;;  %s1034_s29 = smov [#allocation8]  }
   0x6   :  { %s45_s28 = sshll.u32 %s1033_s27, 4  ;;  %s33_s30 = sshll.u32 %s1034_s29, 4  ;;  %s46_s28 = int_to_ptr.vmem [resolvable:$true] %s45_s28  ;;  %s34_s30 = int_to_ptr.vmem [resolvable:$true] %s33_s30 }
   0x7   :  { %s793_s11 = scalar_lea.hbm %s1339_s2, 512 }
   0x8   :  { %p794_p0 = scmp.ne.s32.totalorder %s1339_s2, %s793_s11  ;;  %p797_p1 = scmp.lt.u32.totalorder %s793_s11, %s1339_s2 }
   0xa   :  { %p799_p2 = pnand %p797_p1, %p794_p0 }
   0xc   :  { %802 = shalt.err (!%p799_p2)
}
   0xd   :  { %s803_s16 = scalar_lea.vmem %s46_s28, 512  ;;  %p808_p4 = scmp.lt.s32.totalorder %s46_s28, %s46_s28 }
   0xe   :  { %p804_p3 = scmp.ne.s32.totalorder %s46_s28, %s803_s16  ;;  %p809_p5 = scmp.lt.s32.totalorder %s803_s16, %s803_s16 }
  0x10   :  { %p810_p6 = por %p809_p5, %p808_p4 }
  0x12   :  { %p811_p7 = pnand %p810_p6, %p804_p3 }
  0x14   :  { %814 = shalt.err (!%p811_p7)
}
  0x15   :  { %s1035_s17 = smov 128   ;;  %s1036_s18 = smov 8  }
  0x16   :  { %51 = dma.hbm_to_vmem [thread:$0]  %s1339_s2, 512, %s46_s28, [#allocation10], %s1035_s17, %s1035_s17, %s1036_s18  }
  0x17   :  { %s815_s23 = scalar_lea.hbm %s1337_s0, 16 }
  0x18   :  { %p816_p8 = scmp.ne.s32.totalorder %s1337_s0, %s815_s23  ;;  %p819_p9 = scmp.lt.u32.totalorder %s815_s23, %s1337_s0 }
  0x1a   :  { %p821_p10 = pnand %p819_p9, %p816_p8 }
  0x1c   :  { %824 = shalt.err (!%p821_p10)
}
  0x1d   :  { %s1037_s29 = smov [#allocation4]   ;;  %s825_s11 = scalar_lea.hbm %s1338_s1, 512 }
  0x1e   :  { %27 = dma.hbm_to_smem %s1337_s0, 16, %s1037_s29, [#allocation7]  }
  0x1f   :  { %p826_p11 = scmp.ne.s32.totalorder %s1338_s1, %s825_s11  ;;  %p829_p12 = scmp.lt.u32.totalorder %s825_s11, %s1338_s1 }
  0x21   :  { %p831_p13 = pnand %p829_p12, %p826_p11 }
  0x23   :  { %834 = shalt.err (!%p831_p13)
}
  0x24   :  { %s835_s16 = scalar_lea.vmem %s34_s30, 512  ;;  %p840_p1 = scmp.lt.s32.totalorder %s34_s30, %s34_s30 }
  0x25   :  { %p836_p0 = scmp.ne.s32.totalorder %s34_s30, %s835_s16  ;;  %p841_p2 = scmp.lt.s32.totalorder %s835_s16, %s835_s16 }
  0x27   :  { %p842_p3 = por %p841_p2, %p840_p1 }
  0x29   :  { %p843_p4 = pnand %p842_p3, %p836_p0 }
  0x2b   :  { %846 = shalt.err (!%p843_p4)
}
  0x2c   :  { %39 = dma.hbm_to_vmem [thread:$0]  %s1338_s1, 512, %s34_s30, [#allocation5], %s1035_s17, %s1035_s17, %s1036_s18  }
  0x2d   :  { %s1038_s20 = smov [#allocation11]   ;;  %s1039_s22 = smov [#allocation12]  }
  0x2e   :  { %s57_s21 = sshll.u32 %s1038_s20, 4  ;;  %s69_s23 = sshll.u32 %s1039_s22, 4  ;;  %s58_s21 = int_to_ptr.vmem [resolvable:$true] %s57_s21  ;;  %s70_s23 = int_to_ptr.vmem [resolvable:$true] %s69_s23 }
  0x2f   :  { %s847_s26 = scalar_lea.hbm %s1340_s3, 512 }
  0x30   :  { %p848_p5 = scmp.ne.s32.totalorder %s1340_s3, %s847_s26  ;;  %p851_p6 = scmp.lt.u32.totalorder %s847_s26, %s1340_s3 }
  0x32   :  { %p853_p7 = pnand %p851_p6, %p848_p5 }
  0x34   :  { %856 = shalt.err (!%p853_p7)
}
  0x35   :  { %s857_s1 = scalar_lea.vmem %s58_s21, 512  ;;  %p862_p9 = scmp.lt.s32.totalorder %s58_s21, %s58_s21 }
  0x36   :  { %p858_p8 = scmp.ne.s32.totalorder %s58_s21, %s857_s1  ;;  %p863_p10 = scmp.lt.s32.totalorder %s857_s1, %s857_s1 }
  0x38   :  { %p864_p11 = por %p863_p10, %p862_p9 }
  0x3a   :  { %p865_p12 = pnand %p864_p11, %p858_p8 }
  0x3c   :  { %868 = shalt.err (!%p865_p12)
}
  0x3d   :  { %63 = dma.hbm_to_vmem [thread:$0]  %s1340_s3, 512, %s58_s21, [#allocation10], %s1035_s17, %s1035_s17, %s1036_s18  }
  0x3e   :  { %s869_s12 = scalar_lea.hbm %s1341_s4, 512 }
  0x3f   :  { %p870_p13 = scmp.ne.s32.totalorder %s1341_s4, %s869_s12  ;;  %p873_p0 = scmp.lt.u32.totalorder %s869_s12, %s1341_s4 }
  0x41   :  { %p875_p1 = pnand %p873_p0, %p870_p13 }
  0x43   :  { %878 = shalt.err (!%p875_p1)
}
  0x44   :  { %s879_s0 = scalar_lea.vmem %s70_s23, 512  ;;  %p884_p3 = scmp.lt.s32.totalorder %s70_s23, %s70_s23 }
  0x45   :  { %p880_p2 = scmp.ne.s32.totalorder %s70_s23, %s879_s0  ;;  %p885_p4 = scmp.lt.s32.totalorder %s879_s0, %s879_s0 }
  0x47   :  { %p886_p5 = por %p885_p4, %p884_p3 }
  0x49   :  { %p887_p6 = pnand %p886_p5, %p880_p2 }
  0x4b   :  { %890 = shalt.err (!%p887_p6)
}
  0x4c   :  { %75 = dma.hbm_to_vmem [thread:$0]  %s1341_s4, 512, %s70_s23, [#allocation13], %s1035_s17, %s1035_s17, %s1036_s18  }
  0x4d   :  { %989 = dma.done.wait [#allocation7], 16  }
  0x4e   :  { %990 = vsyncadd [#allocation7], 4294967280 }
  0x4f   :  { %991 = dma.done.wait [#allocation5], 512  }
  0x50   :  { %992 = vsyncadd [#allocation5], 4294966784 }
  0x51   :  { %993 = dma.done.wait [#allocation10], 1024  }
  0x52   :  { %994 = vsyncadd [#allocation10], 4294966272 }
  0x53   :  { %995 = dma.done.wait [#allocation13], 512  }
  0x54   :  { %996 = vsyncadd [#allocation13], 4294966784 }
  0x55   :  { %93 = sfence }
  0x56   :  { %v94_v0 = vlaneseq  ;;  %v1174_v1 = vld [vmem:[#allocation9] sm:$0xff]  ;;  %v1176_v2 = vld [vmem:[#allocation9 + $0x8] sm:$0xff]  ;;  %v1178_v3 = vld [vmem:[#allocation9 + $0x10] sm:$0xff]  ;;  %v1184_v6 = vmov 0.0   ;;  %v1186_v7 = vmov 0.0   ;;  %v1188_v8 = vmov 0.0  }
  0x57   :  { %v1180_v4 = vld [vmem:[#allocation9 + $0x18] sm:$0xff]  ;;  %s1190_s4 = smov 0  }
  0x58   :  { %v1182_v5 = vshrl.u32 %v94_v0, 7 }
  0x59 LB: > { %v670_v9 = vpack.c.bf16 %v1176_v2, %v1174_v1  ;;  %v1040_v10 = vmov 0.0|0.0   ;;  %s1041_s20 = smov 64   ;;  %v673_v11 = vpack.c.bf16 %v1180_v4, %v1178_v3  ;;  %vm1042_vm0 = vmmov 0   ;;  %s109_s21 = sld [smem:[#allocation4 + %s1015_s4]]  ;;  %s1015_s4 = sphi %s1190_s4, %s105_s4   ;;  %v1011_v8 = vphi %v1188_v8, %v1348_v8   ;;  %v1007_v7 = vphi %v1186_v7, %v1347_v7   ;;  %v1003_v6 = vphi %v1184_v6, %v1346_v6  }
  0x5a   : > { %669 = vmatprep.subr.bf16.mxu0 %v1040_v10  ;;  %113 = vrot.lane.b32.xlu0 %v1011_v8, %s1041_s20  ;;  %v1043_v12 = vmov 0.0   ;;  %vm115_vm1 = vcmask 261120   ;;  %s1044_s23 = smov 32   ;;  %s214_s24 = ssub.s32 0, %s1015_s4  ;;  %v229_v30 = vsub.s32 0, %v1182_v5 }
  0x5b   : > { %671 = vmatpush3.bf16.msra.mxu0 %v670_v9  ;;  %644 = vmatprep.mubr.msk.f32.mxu0 %vm1042_vm0, %v1043_v12  ;;  %s597_s25 = smin.u32 %s1015_s4, %s214_s24  ;;  %p213_p7 = scmp.lt.s32.totalorder %s1015_s4, 0 }
  0x5c   : > { %672 = vmatprep.subr.bf16.mxu0 %v1040_v10  ;;  %s216_s26 = sand.u32 7, %s597_s25  }
  0x5d   : > { %s217_s27 = ssub.s32 0, %s216_s26 }
  0x5e   : > { %s1353_s27 = smov (!%p213_p7, %s217_s27), %s216_s26 }
  0x5f   : > { %674 = vmatpush3.bf16.msra.mxu0 %v673_v11  ;;  %s110_s22 = scalar_lea.vmem [#allocation8], %s109_s21  ;;  %p599_p8 = scmp.lt.s32.totalorder %s1353_s27, 0 }
  0x60   : > { %v111_v14 = vld [vmem:[%s110_s22] sm:$0x1]  ;;  %s223_s29 = sadd.s32 8, %s1353_s27 }
  0x61   : > { %s1355_s29 = smov (!%p599_p8, %s223_s29), %s1353_s27 }
  0x62   : > { %v225_v29 = vstv %s1355_s29  ;;  %p600_p9 = scmp.ne.s32.totalorder %s1355_s29, 7 }
  0x63   : > { %vm226_vm2 = vcmp.eq.s32.totalorder %v1182_v5, %v225_v29  ;;  %s1045_s9 = smov (!%p600_p9), 64   ;;  %s614_s10 = scalar_lea.vmem (!%p600_p9), [#allocation2], %s1015_s4 }
  0xcc   : > { %v114_v13 = vpop.permute.xlu0 %113 }
  0xcd   : > { %645 = vmatmul.mubr.msk.f32.vlgmr.msra.gmra.mrb[0].mxu0 %vm115_vm1, %v114_v13 }
 0x1a0   : > { %v184_v15 = vpop.f32.mrb[0].mxu0 }
 0x1a1   : > { %v188_v16 = vadd.f32 %v184_v15, %v111_v14  ;;  %v646_v17 = vpop.f32.mrb[1].mxu0 }
 0x1a3   : > { %777 = vtanh.f32 %v188_v16  ;;  %v596_v19 = vmul.f32 -1.442695, %v188_v16 }
 0x1a5   : > { %779 = vpow2.f32 %v596_v19 }
 0x1ad   : > { %v778_v18 = vpop.eup %777 }
 0x1ae   : > { %198 = vrot.lane.b32.xlu0 %v778_v18, %s1044_s23 }
 0x1af   : > { %v780_v20 = vpop.eup %779 }
 0x1b0   : > { %v192_v21 = vadd.f32 1.0, %v780_v20 }
 0x1b2   : > { %781 = vrcp.f32 %v192_v21 }
 0x1bc   : > { %v782_v22 = vpop.eup %781 }
 0x1bd   : > { %v196_v25 = vmul.f32 %v1007_v7, %v782_v22 }
 0x220   : > { %v199_v23 = vpop.permute.xlu0 %198 }
 0x221   : > { %v201_v24 = vmul.f32 %v782_v22, %v199_v23 }
 0x223   : > { %203 = vrot.lane.b32.xlu1 %v201_v24, %s1044_s23 }
 0x295   : > { %v204_v26 = vpop.permute.xlu1 %203 }
 0x296   : > { %v206_v27 = vadd.f32 %v204_v26, %v196_v25  }
 0x298   : > { %783 = vtanh.f32 %v206_v27 }
 0x2a2   : > { %v784_v28 = vpop.eup %783 }
 0x2a3   : > { %209 = vrot.lane.b32.xlu1 %v784_v28, %s1044_s23 }
 0x314   : > { %235 = sbr.rel (%p600_p9) target bundleno = 911 (0x38f), region = 56 }
 0x315   : > { %v210_v31 = vpop.permute.xlu1 %209 }
 0x316   : > { %v212_v32 = vmul.f32 %v782_v22, %v210_v31  }
 0x318   : > { %v230_v33 = vrot.slane %v212_v32, %v229_v30 }
 0x31a   : > { %v231_v34 = vsel %vm226_vm2, %v230_v33, %v1003_v6  }
 0x31b   : > { %238 = vrot.lane.b32.xlu0 %v231_v34, %s1045_s9 }
 0x38d   : > { %v239_v35 = vpop.permute.xlu0 %238 }
 0x38e   : > { %616 = vst.msk [vmem:[%s614_s10 - $0x7] sm:$0xff] %vm115_vm1, %v239_v35 }
 0x38f PF: > { %s105_s4 = sadd.s32 1, %s1015_s4   ;;  %v1346_v6 = vmov %v231_v34  ;;  %v1347_v7 = vmov %v206_v27  ;;  %v1348_v8 = vmov %v212_v32 }
 0x390   : > { %p102_p10 = scmp.ge.s32.totalorder %s105_s4, 10  }
 0x391   :  { %v1222_v36 = vld [vmem:[#allocation12] sm:$0xff] (%p102_p10)  ;;  %v1224_v37 = vld [vmem:[#allocation12 + $0x8] sm:$0xff] (%p102_p10)  ;;  %v1226_v38 = vld [vmem:[#allocation12 + $0x10] sm:$0xff] (%p102_p10)  ;;  %s1046_s1 = smov (%p102_p10), 64   ;;  %s1047_s30 = smov (%p102_p10), 96   ;;  %vm253_vm3 = vcmask (%p102_p10), 253952  }
 0x392   :  { %104 = sbr.rel (!%p102_p10) target bundleno = 89 (0x59), region = 106  ;;  %244 = vrot.lane.b32.xlu0 (%p102_p10), %v231_v34, %s1046_s1  ;;  %v1229_v39 = vld [vmem:[#allocation12 + $0x18] sm:$0xff] (%p102_p10)  ;;  %v266_v40 = vld [vmem:[#allocation11] sm:$0xff] (%p102_p10)  ;;  %v267_v41 = vld [vmem:[#allocation11 + $0x8] sm:$0xff] (%p102_p10)  ;;  %256 = vrot.lane.b32.xlu1 (%p102_p10), %v206_v27, %s1047_s30  ;;  %v1241_v56 = vmov (%p102_p10), 0.0   ;;  %v1243_v57 = vmov (%p102_p10), 0.0  }
 0x393   :  { %v675_v42 = vpack.c.bf16 (%p102_p10), %v267_v41, %v266_v40  ;;  %v268_v43 = vld [vmem:[#allocation11 + $0x10] sm:$0xff] (%p102_p10)  ;;  %v269_v44 = vld [vmem:[#allocation11 + $0x18] sm:$0xff] (%p102_p10)  ;;  %v603_v51 = vld [vmem:[%s1342_s5] ss:$0 sm:$0xff] (%p102_p10)  ;;  %v1245_v58 = vmov (%p102_p10), 0.0   ;;  %s1247_s11 = smov (%p102_p10), 0  }
 0x394   :  { %v679_v46 = vpack.c.bf16 (%p102_p10), %v269_v44, %v268_v43 }
 0x395   :  { %v264_v45 = vld [vmem:[#allocation2] sm:$0xff] (%p102_p10)  ;;  %676 = vmatprep.subr.bf16.mxu0 (%p102_p10), %v675_v42 }
 0x396   :  { %655 = vmatprep.mubr.msk.f32.mxu0 (%p102_p10), %vm115_vm1, %v264_v45  ;;  %678 = vmatpush3.bf16.msra.mxu0 (%p102_p10), %v675_v42 }
 0x397   :  { %250 = vrot.lane.b32.xlu0 (%p102_p10), %v212_v32, %s1046_s1  ;;  %680 = vmatprep.subr.bf16.mxu0 (%p102_p10), %v679_v46 }
 0x39a   :  { %682 = vmatpush3.bf16.msra.mxu0 %v679_v46 }
 0x404   :  { %v245_v47 = vpop.permute.xlu0 %244  ;;  %v257_v49 = vpop.permute.xlu1 %256 }
 0x405   :  { %248 = vst.msk [vmem:[#allocation2 + $0x8] sm:$0xff] %vm115_vm1, %v245_v47 }
 0x406   :  { %259 = vst.msk [vmem:[#allocation17] sm:$0x1] %vm253_vm3, %v257_v49 }
 0x409   :  { %v251_v50 = vpop.permute.xlu0 %250 }
 0x40a   :  { %254 = vst.msk [vmem:[#allocation15] sm:$0x1] %vm253_vm3, %v251_v50 }
 0x40c   :  { %v265_v48 = vld [vmem:[#allocation2 + $0x8] sm:$0xff] }
 0x40d   :  { %656 = vmatmul.mubr.msk.f32.vlgmr.msra.gmra.mrb[0].mxu0 %vm115_vm1, %v265_v48 }
 0x4e0   :  { %v657_v52 = vpop.f32.mrb[0].mxu0 }
 0x4e1   :  { %v355_v53 = vadd.f32 %v657_v52, %v603_v51  ;;  %v349_v54 = vpop.f32.mrb[1].mxu0 }
 0x4e2   :  { %v350_v55 = vadd.f32 %v603_v51, %v349_v54 }
 0x4e3   :  { %359 = vst [vmem:[#allocation3 + $0x8] sm:$0xff] %v355_v53 }
 0x4e4   :  { %358 = vst [vmem:[#allocation3] sm:$0xff] %v350_v55 }
 0x4e5 LB: > { %v684_v59 = vpack.c.bf16 %v1224_v37, %v1222_v36  ;;  %v1048_v60 = vmov 0.0|0.0   ;;  %s1049_s5 = smov 64   ;;  %v687_v61 = vpack.c.bf16 %v1229_v39, %v1226_v38  ;;  %vm1050_vm4 = vmmov 0   ;;  %s369_s12 = scalar_lea.vmem [#allocation3], %s1031_s11  ;;  %s1031_s11 = sphi %s1247_s11, %s365_s11   ;;  %v1027_v58 = vphi %v1245_v58, %v1351_v58   ;;  %v1023_v57 = vphi %v1243_v57, %v1350_v57   ;;  %v1019_v56 = vphi %v1241_v56, %v1349_v56  }
 0x4e6   : > { %683 = vmatprep.subr.bf16.mxu0 %v1048_v60  ;;  %372 = vrot.lane.b32.xlu0 %v1027_v58, %s1049_s5  ;;  %v1051_v62 = vmov 0.0   ;;  %s1052_s13 = smov 32   ;;  %s472_s14 = ssub.s32 0, %s1031_s11 }
 0x4e7   : > { %685 = vmatpush3.bf16.msra.mxu0 %v684_v59  ;;  %666 = vmatprep.mubr.msk.f32.mxu0 %vm1050_vm4, %v1051_v62  ;;  %s608_s15 = smin.u32 %s1031_s11, %s472_s14  ;;  %p471_p11 = scmp.lt.s32.totalorder %s1031_s11, 0 }
 0x4e8   : > { %686 = vmatprep.subr.bf16.mxu0 %v1048_v60  ;;  %s474_s16 = sand.u32 7, %s608_s15  }
 0x4e9   : > { %s475_s0 = ssub.s32 0, %s474_s16 }
 0x4ea   : > { %s1357_s0 = smov (!%p471_p11, %s475_s0), %s474_s16 }
 0x4eb   : > { %688 = vmatpush3.bf16.msra.mxu0 %v687_v61  ;;  %v370_v0 = vld [vmem:[%s369_s12] sm:$0x1]  ;;  %p610_p12 = scmp.lt.s32.totalorder %s1357_s0, 0  ;;  %s481_s3 = sadd.s32 8, %s1357_s0 }
 0x4ed   : > { %s1359_s3 = smov (!%p610_p12, %s481_s3), %s1357_s0 }
 0x4ee   : > { %v483_v16 = vstv %s1359_s3  ;;  %p611_p13 = scmp.ne.s32.totalorder %s1359_s3, 7 }
 0x4ef   : > { %vm484_vm5 = vcmp.eq.s32.totalorder %v1182_v5, %v483_v16  ;;  %s1053_s19 = smov (!%p611_p13), 64   ;;  %s617_s4 = scalar_lea.vmem (!%p611_p13), [#allocation14], %s1031_s11 }
 0x558   : > { %v373_v63 = vpop.permute.xlu0 %372 }
 0x559   : > { %667 = vmatmul.mubr.msk.f32.vlgmr.msra.gmra.mrb[0].mxu0 %vm115_vm1, %v373_v63 }
 0x62c   : > { %v442_v1 = vpop.f32.mrb[0].mxu0 }
 0x62d   : > { %v446_v2 = vadd.f32 %v442_v1, %v370_v0  ;;  %v668_v3 = vpop.f32.mrb[1].mxu0 }
 0x62f   : > { %785 = vtanh.f32 %v446_v2  ;;  %v607_v6 = vmul.f32 -1.442695, %v446_v2 }
 0x631   : > { %787 = vpow2.f32 %v607_v6 }
 0x639   : > { %v786_v4 = vpop.eup %785 }
 0x63a   : > { %456 = vrot.lane.b32.xlu0 %v786_v4, %s1052_s13 }
 0x63b   : > { %v788_v7 = vpop.eup %787 }
 0x63c   : > { %v450_v8 = vadd.f32 1.0, %v788_v7 }
 0x63e   : > { %789 = vrcp.f32 %v450_v8 }
 0x648   : > { %v790_v9 = vpop.eup %789 }
 0x649   : > { %v454_v12 = vmul.f32 %v1023_v57, %v790_v9 }
 0x6ac   : > { %v457_v10 = vpop.permute.xlu0 %456 }
 0x6ad   : > { %v459_v11 = vmul.f32 %v790_v9, %v457_v10 }
 0x6af   : > { %461 = vrot.lane.b32.xlu1 %v459_v11, %s1052_s13 }
 0x721   : > { %v462_v13 = vpop.permute.xlu1 %461 }
 0x722   : > { %v464_v14 = vadd.f32 %v462_v13, %v454_v12  }
 0x724   : > { %791 = vtanh.f32 %v464_v14 }
 0x72e   : > { %v792_v15 = vpop.eup %791 }
 0x72f   : > { %467 = vrot.lane.b32.xlu1 %v792_v15, %s1052_s13 }
 0x7a0   : > { %493 = sbr.rel (%p611_p13) target bundleno = 2075 (0x81b), region = 67 }
 0x7a1   : > { %v468_v17 = vpop.permute.xlu1 %467 }
 0x7a2   : > { %v470_v18 = vmul.f32 %v790_v9, %v468_v17  }
 0x7a4   : > { %v488_v19 = vrot.slane %v470_v18, %v229_v30 }
 0x7a6   : > { %v489_v20 = vsel %vm484_vm5, %v488_v19, %v1019_v56  }
 0x7a7   : > { %496 = vrot.lane.b32.xlu0 %v489_v20, %s1053_s19 }
 0x819   : > { %v497_v21 = vpop.permute.xlu0 %496 }
 0x81a   : > { %619 = vst.msk [vmem:[%s617_s4 - $0x7] sm:$0xff] %vm115_vm1, %v497_v21 }
 0x81b PF: > { %s365_s11 = sadd.s32 1, %s1031_s11   ;;  %v1349_v56 = vmov %v489_v20  ;;  %v1350_v57 = vmov %v464_v14  ;;  %v1351_v58 = vmov %v470_v18 }
 0x81c   : > { %p362_p0 = scmp.ge.s32.totalorder %s365_s11, 10  }
 0x81d   :  { %507 = vrot.lane.b32.xlu0 (%p362_p0), %v470_v18, %s1046_s1  ;;  %512 = vrot.lane.b32.xlu1 (%p362_p0), %v464_v14, %s1047_s30  ;;  %s1054_s20 = smov (%p362_p0), [#allocation15]   ;;  %s1055_s22 = smov (%p362_p0), [#allocation17]  }
 0x81e   :  { %364 = sbr.rel (!%p362_p0) target bundleno = 1253 (0x4e5), region = 117  ;;  %s534_s21 = sshll.u32 (%p362_p0), %s1054_s20, 4  ;;  %s535_s21 = int_to_ptr.vmem [resolvable:$true] %s534_s21 }
 0x81f   :  { %s544_s23 = sshll.u32 (%p362_p0), %s1055_s22, 4  ;;  %s1056_s24 = smov (%p362_p0), [#allocation14]   ;;  %s1281_s23 = int_to_ptr.vmem [resolvable:$true] %s544_s23 }
 0x820   :  { %s521_s25 = sshll.u32 (%p362_p0), %s1056_s24, 4  ;;  %s891_s26 = scalar_lea.vmem (%p362_p0), %s535_s21, 32  ;;  %s1285_s25 = int_to_ptr.vmem [resolvable:$true] %s521_s25 }
 0x821   :  { %502 = vrot.lane.b32.xlu0 (%p362_p0), %v489_v20, %s1046_s1  ;;  %p892_p1 = scmp.ne.s32.totalorder (%p362_p0), %s535_s21, %s891_s26  ;;  %p896_p2 = scmp.lt.s32.totalorder (%p362_p0), %s535_s21, %s535_s21 }
 0x822   :  { %p897_p3 = scmp.lt.s32.totalorder (%p362_p0), %s891_s26, %s891_s26 }
 0x824   :  { %p898_p4 = por (%p362_p0), %p897_p3, %p896_p2 }
 0x826   :  { %p899_p5 = pnand %p898_p4, %p892_p1 }
 0x88f   :  { %v508_v22 = vpop.permute.xlu0 %507  ;;  %v513_v23 = vpop.permute.xlu1 %512 }
 0x890   :  { %510 = vst.msk [vmem:[#allocation15 + $0x1] sm:$0x1] %vm253_vm3, %v508_v22  ;;  %515 = vst.msk [vmem:[#allocation17 + $0x1] sm:$0x1] %vm253_vm3, %v513_v23 }
 0x891   :  { %902 = shalt.err (!%p899_p5)
}
 0x892   :  { %s903_s9 = scalar_lea.hbm %s1344_s7, 32 }
 0x893   :  { %p904_p6 = scmp.ne.s32.totalorder %s1344_s7, %s903_s9  ;;  %p907_p7 = scmp.lt.u32.totalorder %s903_s9, %s1344_s7 }
 0x895   :  { %p909_p8 = pnand %p907_p7, %p904_p6 }
 0x897   :  { %912 = shalt.err (!%p909_p8)
}
 0x898   :  { %537 = dma.vmem_to_hbm [thread:$0]  %s535_s21, 32, %s1344_s7, [#allocation16]  }
 0x899   :  { %s913_s5 = scalar_lea.vmem %s1281_s23, 32  ;;  %p918_p10 = scmp.lt.s32.totalorder %s1281_s23, %s1281_s23 }
 0x89a   :  { %p914_p9 = scmp.ne.s32.totalorder %s1281_s23, %s913_s5  ;;  %p919_p11 = scmp.lt.s32.totalorder %s913_s5, %s913_s5 }
 0x89c   :  { %p920_p12 = por %p919_p11, %p918_p10 }
 0x89e   :  { %p921_p13 = pnand %p920_p12, %p914_p9 }
 0x8a0   :  { %924 = shalt.err (!%p921_p13)
}
 0x8a1   :  { %s925_s14 = scalar_lea.hbm %s1345_s8, 32 }
 0x8a2   :  { %p926_p0 = scmp.ne.s32.totalorder %s1345_s8, %s925_s14  ;;  %p929_p1 = scmp.lt.u32.totalorder %s925_s14, %s1345_s8 }
 0x8a4   :  { %p931_p2 = pnand %p929_p1, %p926_p0 }
 0x8a6   :  { %934 = shalt.err (!%p931_p2)
}
 0x8a7   :  { %547 = dma.vmem_to_hbm [thread:$0]  %s1281_s23, 32, %s1345_s8, [#allocation16]   ;;  %v503_v5 = vpop.permute.xlu0 %502 }
 0x8a8   :  { %505 = vst.msk [vmem:[#allocation14 + $0x8] sm:$0xff] %vm115_vm1, %v503_v5  ;;  %s935_s4 = scalar_lea.vmem %s1285_s25, 256  ;;  %p940_p4 = scmp.lt.s32.totalorder %s1285_s25, %s1285_s25 }
 0x8a9   :  { %p936_p3 = scmp.ne.s32.totalorder %s1285_s25, %s935_s4  ;;  %p941_p5 = scmp.lt.s32.totalorder %s935_s4, %s935_s4 }
 0x8ab   :  { %p942_p6 = por %p941_p5, %p940_p4 }
 0x8ad   :  { %p943_p7 = pnand %p942_p6, %p936_p3 }
 0x8af   :  { %946 = shalt.err (!%p943_p7)
}
 0x8b0   :  { %s947_s22 = scalar_lea.hbm %s1343_s6, 256 }
 0x8b1   :  { %p948_p8 = scmp.ne.s32.totalorder %s1343_s6, %s947_s22  ;;  %p951_p9 = scmp.lt.u32.totalorder %s947_s22, %s1343_s6 }
 0x8b3   :  { %p953_p10 = pnand %p951_p9, %p948_p8 }
 0x8b5   :  { %956 = shalt.err (!%p953_p10)
}
 0x8b6   :  { %527 = dma.vmem_to_hbm [thread:$0]  %s1285_s25, 256, %s1343_s6, [#allocation6], %s1035_s17, %s1035_s17, %s1036_s18  }
 0x8b7   :  { %997 = dma.done.wait [#allocation6], 256  }
 0x8b8   :  { %998 = vsyncadd [#allocation6], 4294967040 }
 0x8b9   :  { %999 = dma.done.wait [#allocation16], 64  }
 0x8ba   :  { %1000 = vsyncadd [#allocation16], 4294967232 }
 0x8bb   :  { %557 = vsyncpa [#allocation5], 1 }
 0x8bc   :  { %558 = vsyncpa [#allocation10], 1 }
 0x8bd   :  { %559 = vsyncpa [#allocation13], 1 }
 0x8be   :  { %560 = vsyncpa [#allocation6], 1 }
 0x8bf   :  { %561 = vsyncpa [#allocation16], 1 }
 0x8c0   :  { %562 = vsyncpa [#allocation7], 1 }

</bundles_post_ra>
